<compile_context>
chip_gen: v6e
topology: v6e:2x2x1
jax: 0.10.0
libtpu: 0.0.40
codegen_flags: <defaults>
</compile_context>

<pallas_src>
import jax
import jax.numpy as jnp
from jax.experimental import pallas as pl
from jax.experimental.pallas import tpu as pltpu

_EPS = 1e-12                      # F.normalize default eps
_LANE = 128                       # TPU vreg lane width
_BLOCK_BYTES = 4 * 1024 * 1024    # ~4 MiB per-operand block target
_VMEM_LIMIT = 32 * 1024 * 1024    # safe on v5e/v6e (128 MiB) and v7x (64 MiB)
_VMEM_CEIL = 48 * 1024 * 1024     # never exceed (v7x physical = 64 MiB/TC)


def _ceil_div(a, b):
    return -(-a // b)


def _depth_refine_kernel(img_ref, pts_ref, out_ref):
    # Block layout: (t_b, D, t_h, t_w).  The L1 reduction axis D is a leading
    # (non-minor) dim, so the sum is a cheap cross-vreg VALU accumulation.
    prod = img_ref[...] * pts_ref[...]                        # stays in input dtype
    denom = jnp.sum(jnp.abs(prod.astype(jnp.float32)), axis=1, keepdims=True)
    inv = 1.0 / jnp.maximum(denom, _EPS)                      # one exact recip / pixel
    out_ref[...] = prod * inv.astype(prod.dtype)              # broadcast multiply


def _pick_batch_tile(bn, max_b):
    """Largest divisor of bn that fits VMEM, keeping >= min(bn, 4) batch blocks
    so both v7x TensorCores get work when batch is the only parallel axis."""
    if bn <= 1:
        return 1
    limit = bn // 4 if bn >= 4 else bn // 2
    limit = max(1, min(max_b, limit, bn))
    for cand in range(limit, 0, -1):
        if bn % cand == 0:
            return cand
    return 1


def _block_plan(bn, d, hh, ww, itemsize, sub_q, block_bytes):
    """Choose block (t_b, d, t_h, t_w) and grid (nb, nh, nw).  Budgets against
    the padded VMEM footprint; ragged last blocks (via cdiv) are allowed on the
    H / W grid axes since the reduction is strictly over D (fully in-block)."""
    w_vmem = _ceil_div(ww, _LANE) * _LANE

    # --- lane (W) tile -----------------------------------------------------
    min_block = d * sub_q * w_vmem * itemsize                # (1, d, sub_q, ww)
    if min_block <= block_bytes or w_vmem <= _LANE:
        t_w, nw = ww, 1
    else:
        lanes = max(_LANE, ((block_bytes // (d * sub_q * itemsize)) // _LANE) * _LANE)
        t_w = min(w_vmem, lanes)
        if t_w >= ww:
            t_w, nw = ww, 1
        else:
            nw = _ceil_div(ww, t_w)
    t_w_vmem = _ceil_div(t_w, _LANE) * _LANE

    # --- sublane (H) tile ----------------------------------------------------
    bytes_per_hrow = d * t_w_vmem * itemsize
    h_pad = _ceil_div(hh, sub_q) * sub_q
    if h_pad * bytes_per_hrow <= block_bytes:
        t_h, nh = hh, 1
    else:
        t_h = max(sub_q, ((block_bytes // bytes_per_hrow) // sub_q) * sub_q)
        if t_h >= hh:
            t_h, nh = hh, 1
        else:
            nh = _ceil_div(hh, t_h)                          # ragged last block OK

    # --- batch fusion (only when the whole spatial extent fits one block) ---
    if nh == 1 and nw == 1:
        per_batch = d * h_pad * t_w_vmem * itemsize
        max_b = max(1, block_bytes // per_batch)
        t_b = _pick_batch_tile(bn, max_b)
    else:
        t_b = 1
    nb = bn // t_b

    return (t_b, t_h, t_w), (nb, nh, nw)


def _normalize_prod_4d(a, b, *, block_bytes):
    """Run the kernel on an already-4D (BN, D, H', W') pair with no copies."""
    bn, d, hh, ww = a.shape
    dtype = a.dtype
    itemsize = jnp.dtype(dtype).itemsize
    sub_q = max(8, 32 // itemsize)            # sublane quantum: f32=8, bf16=16, int8=32

    (t_b, t_h, t_w), grid = _block_plan(bn, d, hh, ww, itemsize, sub_q, block_bytes)
    block = (t_b, d, t_h, t_w)
    spec = pl.BlockSpec(block, lambda i, j, k: (i, 0, j, k))

    # VMEM budget: 2 inputs + 1 output, double-buffered = 6 padded blocks.
    blk_vmem = (t_b * d * (_ceil_div(t_h, sub_q) * sub_q)
                * (_ceil_div(t_w, _LANE) * _LANE) * itemsize)
    vmem_limit = int(min(_VMEM_CEIL, max(_VMEM_LIMIT, 8 * blk_vmem)))

    n_elem = bn * d * hh * ww
    cost = pl.CostEstimate(flops=5 * n_elem, transcendentals=0,
                           bytes_accessed=3 * n_elem * itemsize)

    return pl.pallas_call(
        _depth_refine_kernel,
        out_shape=jax.ShapeDtypeStruct((bn, d, hh, ww), dtype),
        grid_spec=pltpu.PrefetchScalarGridSpec(
            num_scalar_prefetch=0,
            grid=grid,
            in_specs=[spec, spec],
            out_specs=spec,
        ),
        compiler_params=pltpu.CompilerParams(
            # batch / H / W tiles are independent (reduction is over D, fully
            # in-block) -> all parallel; shards across TCs on v7x.
            dimension_semantics=("parallel", "parallel", "parallel"),
            vmem_limit_bytes=vmem_limit,
        ),
        cost_estimate=cost,
    )(a, b)


def depth_refinement(init_depth_images, pts_depth_images, *, block_bytes=_BLOCK_BYTES):
    """JAX wrapper: NCHW (B*N, D, H, W) depth images -> L1-normalized product."""
    assert init_depth_images.ndim == 4 and pts_depth_images.ndim == 4, \
        "depth image shape (B*N, D, H, W)"
    assert init_depth_images.shape == pts_depth_images.shape

    bn, d, h, w = init_depth_images.shape

    if w >= _LANE:
        # Direct NCHW blocking: zero wrapper-side pad / reshape / slice copies.
        return _normalize_prod_4d(init_depth_images, pts_depth_images,
                                  block_bytes=block_bytes)

    # Small W: reshape H*W into a lane-dense (rows, 128) layout so loads/stores
    # use full vreg lanes.  Pad only up to the single 128 boundary (no padding
    # to tile multiples; ragged row blocks are handled by pl.cdiv in the plan).
    s = h * w
    rows = _ceil_div(s, _LANE)
    s_pad = rows * _LANE

    def prep(x):
        x = x.reshape(bn, d, s)
        if s_pad != s:
            # Padded columns normalize to garbage-free zeros and are sliced away.
            x = jnp.pad(x, ((0, 0), (0, 0), (0, s_pad - s)))
        return x.reshape(bn, d, rows, _LANE)

    out = _normalize_prod_4d(prep(init_depth_images), prep(pts_depth_images),
                             block_bytes=block_bytes)
    out = out.reshape(bn, d, s_pad)
    if s_pad != s:
        out = out[:, :, :s]
    return out.reshape(bn, d, h, w)


def _reference(init_depth_images, pts_depth_images):
    """Pure-JAX reference matching F.normalize(x, dim=1, p=1)."""
    prod = (init_depth_images * pts_depth_images).astype(jnp.float32)
    denom = jnp.maximum(jnp.sum(jnp.abs(prod), axis=1, keepdims=True), _EPS)
    return (prod / denom).astype(init_depth_images.dtype)


if __name__ == "__main__":
    key = jax.random.PRNGKey(0)
    k1, k2, k3, k4, k5, k6, k7, k8 = jax.random.split(key, 8)

    # 1) Small lane-dense path, no padding (H*W multiple of 128).
    bn, d, h, w = 2, 4, 16, 16
    a1 = jax.random.uniform(k1, (bn, d, h, w), dtype=jnp.float32)
    b1 = jax.random.uniform(k2, (bn, d, h, w), dtype=jnp.float32)
    o1 = jax.block_until_ready(depth_refinement(a1, b1))
    assert o1.shape == (bn, d, h, w)
    assert jnp.allclose(o1, _reference(a1, b1), atol=1e-6, rtol=1e-6), "mismatch (1)"

    # 2) Lane-dense path with a non-128-aligned spatial extent (pad + slice).
    a2 = jax.random.uniform(k3, (2, 4, 5, 7), dtype=jnp.float32)
    b2 = jax.random.uniform(k4, (2, 4, 5, 7), dtype=jnp.float32)
    o2 = jax.block_until_ready(depth_refinement(a2, b2))
    assert o2.shape == (2, 4, 5, 7)
    assert jnp.allclose(o2, _reference(a2, b2), atol=1e-6, rtol=1e-6), "mismatch (2)"

    # 3) Direct NCHW path (W >= 128, not a multiple of 128): no wrapper copies.
    a3 = jax.random.uniform(k5, (2, 4, 16, 144), dtype=jnp.float32)
    b3 = jax.random.uniform(k6, (2, 4, 16, 144), dtype=jnp.float32)
    o3 = jax.block_until_ready(depth_refinement(a3, b3))
    assert o3.shape == (2, 4, 16, 144)
    assert jnp.allclose(o3, _reference(a3, b3), atol=1e-6, rtol=1e-6), "mismatch (3)"

    # 4) Force H tiling with a ragged last block (pl.cdiv path) via a tiny block budget.
    a4 = jax.random.uniform(k7, (2, 4, 36, 128), dtype=jnp.float32)
    b4 = jax.random.uniform(k8, (2, 4, 36, 128), dtype=jnp.float32)
    o4 = jax.block_until_ready(depth_refinement(a4, b4, block_bytes=16384))
    assert o4.shape == (2, 4, 36, 128)
    assert jnp.allclose(o4, _reference(a4, b4), atol=1e-6, rtol=1e-6), "mismatch (4)"

    # 5) bf16 path: product kept in bf16, reduction in f32 (looser tolerance).
    a5 = a1.astype(jnp.bfloat16)
    b5 = b1.astype(jnp.bfloat16)
    o5 = jax.block_until_ready(depth_refinement(a5, b5))
    assert o5.shape == (bn, d, h, w) and o5.dtype == jnp.bfloat16
    assert jnp.allclose(o5.astype(jnp.float32),
                        _reference(a5, b5).astype(jnp.float32),
                        atol=2e-2, rtol=2e-2), "mismatch (5, bf16)"

    print("KERNEL_OK")
</pallas_src>

<mosaic_0001>
module attributes {stable_mosaic.version = 11 : i64} {
  func.func @_depth_refine_kernel(%arg0: i32, %arg1: i32, %arg2: i32, %arg3: memref<1x4x2x128xf32, #tpu.memory_space<vmem>>, %arg4: memref<1x4x2x128xf32, #tpu.memory_space<vmem>>, %arg5: memref<1x4x2x128xf32, #tpu.memory_space<vmem>>) attributes {dimension_semantics = [#tpu.dimension_semantics<parallel>, #tpu.dimension_semantics<parallel>, #tpu.dimension_semantics<parallel>], iteration_bounds = array<i64: 2, 1, 1>, scalar_prefetch = 0 : i64, scratch_operands = 0 : i64, tpu.core_type = #tpu.core_type<tc>, window_params = [{transform_indices = @transform_0, window_bounds = array<i64: 1, 4, 2, 128>}, {transform_indices = @transform_1, window_bounds = array<i64: 1, 4, 2, 128>}, {transform_indices = @transform_2, window_bounds = array<i64: 1, 4, 2, 128>}]} {
    %c0 = arith.constant 0 : index
    %c0_0 = arith.constant 0 : index
    %c0_1 = arith.constant 0 : index
    %c0_2 = arith.constant 0 : index
    %0 = vector.load %arg3[%c0, %c0_0, %c0_1, %c0_2] : memref<1x4x2x128xf32, #tpu.memory_space<vmem>>, vector<1x4x2x128xf32>
    %c0_3 = arith.constant 0 : index
    %c0_4 = arith.constant 0 : index
    %c0_5 = arith.constant 0 : index
    %c0_6 = arith.constant 0 : index
    %1 = vector.load %arg4[%c0_3, %c0_4, %c0_5, %c0_6] : memref<1x4x2x128xf32, #tpu.memory_space<vmem>>, vector<1x4x2x128xf32>
    %2 = arith.mulf %0, %1 : vector<1x4x2x128xf32>
    %3 = math.absf %2 : vector<1x4x2x128xf32>
    %cst = arith.constant dense<0.000000e+00> : vector<1x2x128xf32>
    %4 = vector.multi_reduction <add>, %3, %cst [1] : vector<1x4x2x128xf32> to vector<1x2x128xf32>
    %5 = vector.shape_cast %4 : vector<1x2x128xf32> to vector<1x1x2x128xf32>
    %cst_7 = arith.constant 9.99999996E-13 : f32
    %6 = vector.broadcast %cst_7 : f32 to vector<1x1x2x128xf32>
    %7 = arith.maximumf %5, %6 : vector<1x1x2x128xf32>
    %cst_8 = arith.constant 1.000000e+00 : f32
    %8 = vector.broadcast %cst_8 : f32 to vector<1x1x2x128xf32>
    %9 = arith.divf %8, %7 : vector<1x1x2x128xf32>
    %10 = vector.broadcast %9 : vector<1x1x2x128xf32> to vector<1x4x2x128xf32>
    %11 = arith.mulf %2, %10 : vector<1x4x2x128xf32>
    %c0_9 = arith.constant 0 : index
    %c0_10 = arith.constant 0 : index
    %c0_11 = arith.constant 0 : index
    %c0_12 = arith.constant 0 : index
    %12 = vector.load %arg5[%c0_9, %c0_10, %c0_11, %c0_12] : memref<1x4x2x128xf32, #tpu.memory_space<vmem>>, vector<1x4x2x128xf32>
    tpu.vector_store %arg5[%c0_9, %c0_10, %c0_11, %c0_12], %11 {strides = array<i32>} : memref<1x4x2x128xf32, #tpu.memory_space<vmem>>, vector<1x4x2x128xf32>,
    return
  }
  func.func @transform_0(%arg0: i32, %arg1: i32, %arg2: i32) -> (i32, i32, i32, i32) {
    %c0_i32 = arith.constant 0 : i32
    %c0_i32_0 = arith.constant 0 : i32
    return %arg0, %c0_i32, %arg1, %arg2 : i32, i32, i32, i32
  }
  func.func @transform_1(%arg0: i32, %arg1: i32, %arg2: i32) -> (i32, i32, i32, i32) {
    %c0_i32 = arith.constant 0 : i32
    %c0_i32_0 = arith.constant 0 : i32
    return %arg0, %c0_i32, %arg1, %arg2 : i32, i32, i32, i32
  }
  func.func @transform_2(%arg0: i32, %arg1: i32, %arg2: i32) -> (i32, i32, i32, i32) {
    %c0_i32 = arith.constant 0 : i32
    %c0_i32_0 = arith.constant 0 : i32
    return %arg0, %c0_i32, %arg1, %arg2 : i32, i32, i32, i32
  }
}

</mosaic_0001>

<bundles_post_ra>
// kernel: tpu_custom_call.1
= control target key start
LH: loop header
LB: loop body
LE: loop exit
PB: predicated region body
PF: predicated region fallthrough
CT: control target
= control target key end

     0   :  { %7 = vsyncpa [#allocation3], 0  ;;  %s849_s0 = inlined_call_operand.hbm [shape: f32[2,4,2,128], index: 0, kind: input, shape index: {}]   ;;  %s850_s1 = inlined_call_operand.hbm [shape: f32[2,4,2,128], index: 1, kind: input, shape index: {}]   ;;  %s851_s2 = inlined_call_operand.hbm [shape: f32[2,4,2,128], index: 2, kind: output, shape index: {}]  }
   0x1   :  { %9 = vsyncpa [#allocation3 + $0x1], 0 }
   0x2   :  { %10 = vsyncpa [#allocation6], 0 }
   0x3   :  { %12 = vsyncpa [#allocation6 + $0x1], 0 }
   0x4   :  { %13 = vsyncpa [#allocation4], 0 }
   0x5   :  { %15 = vsyncpa [#allocation4 + $0x1], 0  ;;  %s663_s9 = smov 0   ;;  %s665_s10 = smov 0  }
   0x6   :  { %s667_s11 = smov 0   ;;  %s669_s12 = smov 0  }
   0x7   :  { %s671_s13 = smov 0   ;;  %s673_s14 = smov 0  }
   0x8 LB: > { %s404_s15 = sadd.s32 4294967295, %s639_s14   ;;  %s405_s16 = sadd.s32 4294967294, %s639_s14   ;;  %s639_s14 = sphi %s673_s14, %s21_s14   ;;  %s635_s13 = sphi %s671_s13, %s862_s13   ;;  %s631_s12 = sphi %s669_s12, %s861_s12   ;;  %s627_s11 = sphi %s667_s11, %s860_s11   ;;  %s623_s10 = sphi %s665_s10, %s859_s10   ;;  %s619_s9 = sphi %s663_s9, %s858_s9  }
   0x9   : > { %s40_s17 = sadd.s32 1, %s635_s13  ;;  %s51_s18 = sadd.s32 1, %s627_s11 }
   0xa   : > { %p42_p0 = scmp.ge.s32.totalorder %s40_s17, 2  ;;  %p58_p1 = scmp.ne.s32.totalorder %s627_s11, %s623_s10 }
   0xb   : > { %p59_p2 = scmp.eq.s32.totalorder %s639_s14, 0  ;;  %p64_p3 = scmp.ne.s32.totalorder %s623_s10, %s619_s9 }
   0xc   : > { %s864_s17 = smov (%p42_p0, %s40_s17), 0  ;;  %p65_p5 = scmp.eq.s32.totalorder %s404_s15, 0 }
   0xd   : > { %p704_p4 = por %p59_p2, %p58_p1  ;;  %s44_s20 = ssub.s32 %s635_s13, %s864_s17 }
   0xe   : > { %p122_p6 = scmp.eq.s32.totalorder %s404_s15, 1  ;;  %p49_p7 = scmp.eq.s32.totalorder %s44_s20, 0 }
   0xf   : > { %p710_p8 = por %p65_p5, %p64_p3  ;;  %p128_p10 = scmp.eq.s32.totalorder %s405_s16, 1 }
  0x10   : > { %p714_p9 = por %p122_p6, %p58_p1  ;;  %p407_p12 = scmp.ge.s32.totalorder %s639_s14, 2 }
  0x11   : > { %s719_s23 = scalar_select %p49_p7, %s627_s11, %s51_s18  }
  0x12   : > { %p721_p11 = por %p128_p10, %p64_p3  ;;  %p443_p13 = scmp.lt.s32.totalorder %s639_s14, 2 }
  0x13   : > { %s728_s25 = sand.u32 1, %s627_s11   ;;  %s423_s27 = sshll.u32 %s635_s13, 7 }
  0x14   : > { %s408_s26 = sshll.u32 %s728_s25, 3  ;;  %s160_s30 = scalar_lea.hbm %s849_s0, %s423_s27 }
  0x15   : > { %s152_s3 = scalar_lea.vmem [#allocation2], %s408_s26  ;;  %p741_p0 = pnand %p443_p13, %p704_p4 }
  0x16   : > { %s161_s4 = sshll.u32 %s152_s3, 4  ;;  %p414_p1 = scmp.ge.s32.totalorder %s639_s14, 1  ;;  %s162_s4 = int_to_ptr.vmem [resolvable:$true] %s161_s4 }
  0x17   : > { %s149_s6 = scalar_lea.sflag [#allocation3], %s728_s25  ;;  %p501_p2 = pneg %p741_p0 }
  0x18   : > { %s512_s7 = scalar_lea.vmem %s162_s4, 128  ;;  %s641_s8 = smov [#allocation2]  }
  0x19   : > { %p513_p3 = scmp.ne.s32.totalorder %s162_s4, %s512_s7  ;;  %s517_s15 = sshll.u32 %s641_s8, 4  ;;  %s518_s15 = int_to_ptr.vmem [resolvable:$false] %s517_s15 }
  0x1a   : > { %s519_s16 = scalar_lea.vmem %s518_s15, 256  ;;  %p520_p4 = scmp.lt.s32.totalorder %s162_s4, %s518_s15 }
  0x1b   : > { %p515_p5 = pnand %p513_p3, %p501_p2  ;;  %p521_p7 = scmp.lt.s32.totalorder %s519_s16, %s512_s7 }
  0x1d   : > { %p516_p6 = pneg %p515_p5  ;;  %p522_p10 = por %p521_p7, %p520_p4 }
  0x1f   : > { %p523_p13 = pnand %p522_p10, %p516_p6 }
  0x21   : > { %526 = shalt.err (!%p523_p13)
}
  0x22   : > { %s642_s18 = smov 32   ;;  %s643_s19 = smov 2  }
  0x23   : > { %435 = dma.hbm_to_vmem [thread:$0]  (!%p741_p0), %s160_s30, 128, %s162_s4, %s149_s6, %s642_s18, %s642_s18, %s643_s19  }
  0x24   : > { %p192_p3 = scmp.lt.s32.totalorder %s639_s14, 3  ;;  %s183_s29 = scalar_lea.hbm %s850_s1, %s423_s27 }
  0x25   : > { %s175_s7 = scalar_lea.vmem [#allocation5], %s408_s26  ;;  %s172_s15 = scalar_lea.sflag [#allocation6], %s728_s25 }
  0x26   : > { %p762_p5 = pnand %p414_p1, %p192_p3  ;;  %s184_s8 = sshll.u32 %s175_s7, 4  ;;  %s185_s8 = int_to_ptr.vmem [resolvable:$true] %s184_s8 }
  0x27   : > { %s540_s16 = scalar_lea.vmem %s185_s8, 128  ;;  %s644_s30 = smov [#allocation5]  }
  0x28   : > { %p541_p6 = scmp.ne.s32.totalorder %s185_s8, %s540_s16  ;;  %s545_s4 = sshll.u32 %s644_s30, 4  ;;  %s546_s4 = int_to_ptr.vmem [resolvable:$false] %s545_s4 }
  0x29   : > { %s547_s27 = scalar_lea.vmem %s546_s4, 256  ;;  %p548_p10 = scmp.lt.s32.totalorder %s185_s8, %s546_s4 }
  0x2a   : > { %p543_p4 = pnand %p541_p6, %p501_p2  ;;  %p549_p1 = scmp.lt.s32.totalorder %s547_s27, %s540_s16 }
  0x2c   : > { %p544_p7 = pneg %p543_p4  ;;  %p550_p13 = por %p549_p1, %p548_p10 }
  0x2e   : > { %p551_p3 = pnand %p550_p13, %p544_p7 }
  0x30   : > { %554 = shalt.err (!%p551_p3)
}
  0x31   : > { %438 = dma.hbm_to_vmem [thread:$0]  (!%p741_p0), %s183_s29, 128, %s185_s8, %s172_s15, %s642_s18, %s642_s18, %s643_s19  }
  0x32   : > { %196 = sbr.rel (%p762_p5) target bundleno = 105 (0x69), region = 28  ;;  %s777_s25 = sand.u32 (!%p762_p5), 1, %s623_s10  }
  0x33   : > { %s780_s26 = sshll.u32 (!%p762_p5), %s777_s25, 3  ;;  %s199_s6 = scalar_lea.sflag (!%p762_p5), [#allocation3], %s777_s25 }
  0x34   : > { %s202_s20 = scalar_lea.vmem (!%p762_p5), [#allocation2], %s780_s26 }
  0x37   : > { %606 = dma.done.wait (%p710_p8), %s199_s6, 128  }
  0x38   : > { %608 = vsyncadd (%p710_p8), %s199_s6, 4294967168  ;;  %s208_s5 = scalar_lea.sflag [#allocation6], %s777_s25  ;;  %s211_s18 = scalar_lea.vmem [#allocation5], %s780_s26 }
  0x39   : > { %610 = dma.done.wait (%p710_p8), %s208_s5, 128  }
  0x3a   : > { %612 = vsyncadd (%p710_p8), %s208_s5, 4294967168  ;;  %v237_v0 = vld [vmem:[%s202_s20] sm:$0x3]  ;;  %v238_v1 = vld [vmem:[%s202_s20 + $0x2] sm:$0x3]  ;;  %vm253_vm0 = vcmask 1041408  }
  0x3b   : > { %v239_v2 = vld [vmem:[%s202_s20 + $0x4] sm:$0x3]  ;;  %v240_v3 = vld [vmem:[%s202_s20 + $0x6] sm:$0x3]  ;;  %v241_v4 = vld [vmem:[%s211_s18] sm:$0x3] }
  0x3c   : > { %v242_v5 = vld [vmem:[%s211_s18 + $0x2] sm:$0x3]  ;;  %v243_v6 = vld [vmem:[%s211_s18 + $0x4] sm:$0x3]  ;;  %v244_v7 = vld [vmem:[%s211_s18 + $0x6] sm:$0x3]  ;;  %v245_v8 = vmul.f32 %v241_v4, %v237_v0 }
  0x3d   : > { %v246_v9 = vmul.f32 %v242_v5, %v238_v1  ;;  %v247_v10 = vmul.f32 %v243_v6, %v239_v2  ;;  %v248_v11 = vmul.f32 %v244_v7, %v240_v3  ;;  %s236_s21 = scalar_lea.vmem [#allocation7], %s780_s26  ;;  %s425_s28 = sshll.u32 %s631_s12, 7 }
  0x3e   : > { %v249_v12 = vand.u32 2147483647, %v245_v8  ;;  %s288_s19 = sshll.u32 %s236_s21, 4  ;;  %s801_s7 = scalar_lea.hbm %s851_s2, %s425_s28  ;;  %s796_s19 = int_to_ptr.vmem [resolvable:$true] %s288_s19 }
  0x3f   : > { %v250_v13 = vand.u32 2147483647, %v246_v9  ;;  %v251_v14 = vand.u32 2147483647, %v247_v10  ;;  %v252_v15 = vand.u32 2147483647, %v248_v11 }
  0x40   : > { %v254_v16 = vsel %vm253_vm0, %v249_v12, 0.0  ;;  %s273_s12 = scalar_lea.sflag [#allocation4], %s777_s25  ;;  %s555_s8 = scalar_lea.vmem %s796_s19, 128 }
  0x41   : > { %v255_v17 = vsel %vm253_vm0, %v250_v13, 0.0  ;;  %v257_v19 = vsel %vm253_vm0, %v251_v14, 0.0  ;;  %v259_v20 = vsel %vm253_vm0, %v252_v15, 0.0  ;;  %p556_p8 = scmp.ne.s32.totalorder %s796_s19, %s555_s8  ;;  %s645_s15 = smov [#allocation7]  }
  0x42   : > { %v256_v18 = vadd.f32 %v255_v17, %v254_v16  ;;  %s559_s16 = sshll.u32 %s645_s15, 4  ;;  %s560_s16 = int_to_ptr.vmem [resolvable:$false] %s559_s16 }
  0x43   : > { %p557_p0 = pnand %p556_p8, %p714_p9  ;;  %s561_s30 = scalar_lea.vmem %s560_s16, 256 }
  0x44   : > { %v258_v21 = vadd.f32 %v257_v19, %v256_v18  ;;  %p562_p5 = scmp.lt.s32.totalorder %s796_s19, %s560_s16  ;;  %p563_p6 = scmp.lt.s32.totalorder %s561_s30, %s555_s8 }
  0x45   : > { %p558_p2 = pneg %p557_p0 }
  0x46   : > { %v260_v22 = vadd.f32 %v259_v20, %v258_v21  ;;  %p564_p4 = por %p563_p6, %p562_p5 }
  0x48   : > { %v261_v23 = vmax.f32 %v260_v22, 1e-12  ;;  %p565_p7 = pnand %p564_p4, %p558_p2 }
  0x4a   : > { %497 = vrcp.f32 %v261_v23 }
  0x57   : > { %v498_v24 = vpop.eup %497 }
  0x58   : > { %v264_v25 = vmul.f32 %v498_v24, %v245_v8  ;;  %v265_v26 = vmul.f32 %v498_v24, %v246_v9  ;;  %v266_v27 = vmul.f32 %v498_v24, %v247_v10  ;;  %v267_v28 = vmul.f32 %v498_v24, %v248_v11 }
  0x5a   : > { %268 = vst [vmem:[%s236_s21] sm:$0x3] %v264_v25  ;;  %269 = vst [vmem:[%s236_s21 + $0x2] sm:$0x3] %v265_v26 }
  0x5b   : > { %270 = vst [vmem:[%s236_s21 + $0x4] sm:$0x3] %v266_v27  ;;  %271 = vst [vmem:[%s236_s21 + $0x6] sm:$0x3] %v267_v28 }
  0x5c   : > { %568 = shalt.err (!%p565_p7)
}
  0x5d   : > { %s569_s4 = scalar_lea.hbm %s801_s7, 128  ;;  %s573_s6 = scalar_lea.hbm %s851_s2, 256 }
  0x5e   : > { %p570_p10 = scmp.ne.s32.totalorder %s801_s7, %s569_s4  ;;  %p574_p3 = scmp.lt.s32.totalorder %s801_s7, %s851_s2 }
  0x5f   : > { %p575_p8 = scmp.lt.s32.totalorder %s573_s6, %s569_s4 }
  0x60   : > { %p571_p1 = pnand %p570_p10, %p714_p9 }
  0x61   : > { %p576_p0 = por %p575_p8, %p574_p3 }
  0x62   : > { %p572_p13 = pneg %p571_p1 }
  0x64   : > { %p577_p2 = pnand %p576_p0, %p572_p13 }
  0x66   : > { %580 = shalt.err (!%p577_p2)
}
  0x67   : > { %s646_s18 = smov 32   ;;  %s647_s21 = smov 2  }
  0x68   : > { %430 = dma.vmem_to_hbm [thread:$0]  (%p714_p9), %s796_s19, 128, %s801_s7, %s273_s12, %s646_s18, %s646_s18, %s647_s21  }
  0x69 PF: > { %s303_s28 = sand.u32 1, %s619_s9   ;;  %p440_p5 = pnand %p407_p12, %p721_p11 }
  0x6a   : > { %s304_s29 = scalar_lea.sflag [#allocation4], %s303_s28 }
  0x6b   : > { %p441_p6 = pneg %p440_p5 }
  0x6d   : > { %614 = dma.done.wait (%p441_p6), %s304_s29, 128  }
  0x6e   : > { %616 = vsyncadd (%p441_p6), %s304_s29, 4294967168  ;;  %s21_s14 = sadd.s32 1, %s639_s14   ;;  %s858_s9 = smov %s623_s10 }
  0x6f   : > { %p18_p4 = scmp.ge.s32.totalorder %s21_s14, 4   ;;  %s859_s10 = smov %s627_s11 }
  0x70   : > { %s860_s11 = smov %s719_s23  ;;  %s861_s12 = smov %s635_s13 }
  0x71   : > { %s862_s13 = smov %s864_s17  ;;  %20 = sbr.rel (!%p18_p4) target bundleno = 8 (0x8), region = 86 }
  0x76   :  { %309 = vsyncpa [#allocation3], 1 }
  0x77   :  { %311 = vsyncpa [#allocation3 + $0x1], 1 }
  0x78   :  { %312 = vsyncpa [#allocation6], 1 }
  0x79   :  { %314 = vsyncpa [#allocation6 + $0x1], 1 }
  0x7a   :  { %315 = vsyncpa [#allocation4], 1 }
  0x7b   :  { %317 = vsyncpa [#allocation4 + $0x1], 1 }

</bundles_post_ra>
